<compile_context>
chip_gen: v7x
topology: tpu7x:2x2x1
jax: 0.10.0
libtpu: 0.0.40
codegen_flags: <defaults>
</compile_context>

<pallas_src>
import functools

import jax
import jax.numpy as jnp
from jax.experimental import pallas as pl
from jax.experimental.pallas import tpu as pltpu


# ---------------------------------------------------------------------------
# Kernels
# ---------------------------------------------------------------------------
def _se_fused_kernel(x_ref, w1_ref, w2_ref, o_ref):
    """Single-pass SE on one (Bt, C, HW) block.

    x_ref : (Bt, C, HW)  channels on sublanes, flattened spatial on lanes
    w1_ref: (C, Cr)      first Linear, (in, out) layout, 1/HW already folded in
    w2_ref: (Cr, C)      second Linear, (in, out) layout
    """
    pooled = jnp.sum(x_ref[...].astype(jnp.float32), axis=-1)              # (Bt, C)
    h = jnp.dot(pooled, w1_ref[...], preferred_element_type=jnp.float32)   # (Bt, Cr)
    h = jnp.maximum(h, 0.0)
    y = jax.nn.sigmoid(
        jnp.dot(h, w2_ref[...], preferred_element_type=jnp.float32))       # (Bt, C)
    # Re-read x from the VMEM ref for the scale (cheap vld); keeps vreg pressure
    # bounded when the fused block is large.
    o_ref[...] = (x_ref[...].astype(jnp.float32) * y[:, :, None]).astype(o_ref.dtype)


def _se_pool_fc_kernel(x_ref, w1_ref, w2_ref, y_ref, acc_ref, *, hw_tile, hw_total):
    """Two-pass, pass 1: streaming pool over HW tiles, FC chain on the last tile."""
    h = pl.program_id(1)

    @pl.when(h == 0)
    def _():
        acc_ref[...] = jnp.zeros_like(acc_ref)

    x = x_ref[...].astype(jnp.float32)                                     # (Bt, C, hw_tile)
    if hw_total % hw_tile != 0:
        # Partial last HW tile: zero out-of-range lanes so they don't pollute the sum.
        lane = jax.lax.broadcasted_iota(jnp.int32, x.shape, dimension=2)
        x = jnp.where(h * hw_tile + lane < hw_total, x, 0.0)
    acc_ref[...] += jnp.sum(x, axis=-1)                                    # (Bt, C)

    @pl.when(h == pl.num_programs(1) - 1)
    def _():
        hid = jnp.maximum(
            jnp.dot(acc_ref[...], w1_ref[...], preferred_element_type=jnp.float32), 0.0)
        y_ref[...] = jax.nn.sigmoid(
            jnp.dot(hid, w2_ref[...], preferred_element_type=jnp.float32)
        ).astype(y_ref.dtype)


def _se_scale_kernel(x_ref, y_ref, o_ref):
    """Two-pass, pass 2: out = x * y, lane-dense streaming over (batch, HW) tiles."""
    b = pl.program_id(0)
    yb = y_ref[pl.ds(b, 1), :]                                             # (1, C)
    o_ref[...] = (x_ref[...].astype(jnp.float32) * yb[:, :, None]).astype(o_ref.dtype)


# ---------------------------------------------------------------------------
# Tile / VMEM policy
# ---------------------------------------------------------------------------
def _tpu_vmem_and_cores():
    """Best-effort generation-aware (physical VMEM bytes, TensorCores per chip)."""
    vmem_cap = 64 << 20     # conservative default: v7x has the smallest per-TC VMEM
    cores = 1
    try:
        info = pltpu.get_tpu_info()
        vmem_cap = int(getattr(info, "vmem_capacity_bytes", vmem_cap))
        for name in ("num_tensorcores", "tensorcores_per_chip", "num_cores",
                     "cores_per_chip"):
            v = getattr(info, name, None)
            if isinstance(v, int) and 1 <= v <= 8:
                cores = v
                break
    except Exception:       # no TPU info available -> conservative defaults
        pass
    return vmem_cap, cores


def _pick_batch_tile(B, bytes_per_elem, *, target_block_bytes, vmem_budget_bytes,
                     num_tensorcores):
    """Batch-tile size for the single-pass kernel."""
    # Largest tile that meets (a) the per-block byte target (~85% of HBM roofline
    # already at 1-4 MiB blocks) and (b) the hard VMEM cap (in+out, double-buffered).
    bt = min(B,
             max(1, target_block_bytes // bytes_per_elem),
             max(1, vmem_budget_bytes // (4 * bytes_per_elem)))
    # Prefer >= 4 grid steps so writeback of step i-1 overlaps the read of i+1,
    # but never shrink a block below ~1 MiB just to add steps.
    min_steps = max(4, 2 * num_tensorcores) if num_tensorcores > 1 else 4
    bt_steps = max(1, pl.cdiv(B, min_steps))
    if bt_steps < bt and bt_steps * bytes_per_elem >= (1 << 20):
        bt = bt_steps
    # Multi-TC chips (v7x): an idle core forfeits its HBM share, so give every
    # core at least one grid step when B allows.  Single-TC v5e/v6e skip this
    # (splitting tiny work only adds ~0.35us/step overhead for nothing).
    if num_tensorcores > 1 and B >= num_tensorcores:
        bt = min(bt, max(1, pl.cdiv(B, num_tensorcores)))
    return bt


def _hw_tile_for(hw, per_lane_bytes, target_block_bytes):
    """Largest lane-dense HW tile (multiple of 128, or full HW) meeting the target."""
    if hw * per_lane_bytes <= target_block_bytes:
        return hw
    t = (target_block_bytes // per_lane_bytes) // 128 * 128
    return max(128, t)


# ---------------------------------------------------------------------------
# Dispatch
# ---------------------------------------------------------------------------
def _se_single_pass(x3, w1s, w2f, *, num_tensorcores, block_target_bytes,
                    vmem_budget, vmem_limit):
    B, C, HW = x3.shape
    Cr = w1s.shape[1]
    itemsize = jnp.dtype(x3.dtype).itemsize
    bytes_per_elem = C * HW * itemsize

    bt = _pick_batch_tile(B, bytes_per_elem,
                          target_block_bytes=block_target_bytes,
                          vmem_budget_bytes=vmem_budget,
                          num_tensorcores=num_tensorcores)
    # cdiv grid with a partial last batch tile: Bt never collapses for awkward B.
    # OOB batch rows read garbage that runs harmlessly through pool/FC/sigmoid and
    # is dropped on the masked store; the HW reduction axis is never padded.
    grid = (pl.cdiv(B, bt),)

    cost = pl.CostEstimate(
        flops=2 * B * C * HW + 2 * B * (C * Cr + Cr * C),
        transcendentals=B * C,
        bytes_accessed=2 * B * C * HW * itemsize + (C * Cr + Cr * C) * 4,
    )
    return pl.pallas_call(
        _se_fused_kernel,
        out_shape=jax.ShapeDtypeStruct((B, C, HW), x3.dtype),
        grid_spec=pltpu.PrefetchScalarGridSpec(
            num_scalar_prefetch=0,
            grid=grid,
            in_specs=[
                pl.BlockSpec((bt, C, HW), lambda b: (b, 0, 0)),
                pl.BlockSpec((C, Cr), lambda b: (0, 0)),   # weights resident across grid
                pl.BlockSpec((Cr, C), lambda b: (0, 0)),
            ],
            out_specs=pl.BlockSpec((bt, C, HW), lambda b: (b, 0, 0)),
        ),
        compiler_params=pltpu.CompilerParams(
            dimension_semantics=("parallel",),
            vmem_limit_bytes=vmem_limit,
        ),
        cost_estimate=cost,
    )(x3, w1s, w2f)


def _se_two_pass(x3, w1s, w2f, *, block_target_bytes, vmem_limit):
    """Streaming fallback when one batch element exceeds the block budget."""
    B, C, HW = x3.shape
    Cr = w1s.shape[1]
    itemsize = jnp.dtype(x3.dtype).itemsize

    # ---- Pass 1: pool over HW tiles -> FC -> ReLU -> FC -> sigmoid -> y (B, C) ----
    bt1 = B if B <= 8 else 8                       # sublane-aligned y block (or full B)
    hw_t1 = _hw_tile_for(HW, bt1 * C * itemsize, block_target_bytes)
    grid1 = (pl.cdiv(B, bt1), pl.cdiv(HW, hw_t1))

    y = pl.pallas_call(
        functools.partial(_se_pool_fc_kernel, hw_tile=hw_t1, hw_total=HW),
        out_shape=jax.ShapeDtypeStruct((B, C), jnp.float32),
        grid_spec=pltpu.PrefetchScalarGridSpec(
            num_scalar_prefetch=0,
            grid=grid1,
            in_specs=[
                pl.BlockSpec((bt1, C, hw_t1), lambda b, h: (b, 0, h)),
                pl.BlockSpec((C, Cr), lambda b, h: (0, 0)),
                pl.BlockSpec((Cr, C), lambda b, h: (0, 0)),
            ],
            out_specs=pl.BlockSpec((bt1, C), lambda b, h: (b, 0)),
            scratch_shapes=[pltpu.VMEM((bt1, C), jnp.float32)],
        ),
        compiler_params=pltpu.CompilerParams(
            dimension_semantics=("parallel", "arbitrary"),
            vmem_limit_bytes=vmem_limit,
        ),
        cost_estimate=pl.CostEstimate(
            flops=2 * B * C * HW + 2 * B * (C * Cr + Cr * C),
            transcendentals=B * C,
            bytes_accessed=B * C * HW * itemsize + B * C * 4,
        ),
    )(x3, w1s, w2f)

    # ---- Pass 2: out = x * y, lane-dense 2-D (batch, HW) grid, both parallel ----
    hw_t2 = _hw_tile_for(HW, C * itemsize, block_target_bytes)
    grid2 = (B, pl.cdiv(HW, hw_t2))

    return pl.pallas_call(
        _se_scale_kernel,
        out_shape=jax.ShapeDtypeStruct((B, C, HW), x3.dtype),
        grid_spec=pltpu.PrefetchScalarGridSpec(
            num_scalar_prefetch=0,
            grid=grid2,
            in_specs=[
                pl.BlockSpec((1, C, hw_t2), lambda b, h: (b, 0, h)),
                pl.BlockSpec((B, C), lambda b, h: (0, 0)),    # tiny gate table, resident
            ],
            out_specs=pl.BlockSpec((1, C, hw_t2), lambda b, h: (b, 0, h)),
        ),
        compiler_params=pltpu.CompilerParams(
            dimension_semantics=("parallel", "parallel"),
            vmem_limit_bytes=vmem_limit,
        ),
        cost_estimate=pl.CostEstimate(
            flops=B * C * HW,
            transcendentals=0,
            bytes_accessed=2 * B * C * HW * itemsize + B * C * 4,
        ),
    )(x3, y)


def se_layer(x, w1_t, w2_t, *, num_tensorcores=None, block_target_bytes=None,
             force_two_pass=False):
    """SELayer forward.  x: (B, C, H, W) NCHW; w1_t: (C, C//r); w2_t: (C//r, C)."""
    B, C, H, W = x.shape
    HW = H * W
    itemsize = jnp.dtype(x.dtype).itemsize

    vmem_cap, cores = _tpu_vmem_and_cores()
    if num_tensorcores is None:
        num_tensorcores = cores
    # One consistent, generation-aware VMEM story: compiler limit and tile-sizing
    # budget both derive from the chip's physical capacity
    # (-> ~48 MiB on v7x's 64 MiB VMEM; ~96 MiB on v5e/v6e's 128 MiB).
    vmem_limit = min((vmem_cap * 3) // 4, 96 << 20)
    vmem_budget = max(vmem_limit - (8 << 20), 8 << 20)   # headroom: weights/scratch
    if block_target_bytes is None:
        block_target_bytes = 4 << 20                      # ~roofline at 1-4 MiB blocks

    x3 = x.reshape(B, C, HW)
    # Fold the average-pool's 1/HW into W1 (linear), so the in-kernel pool is a
    # plain lane-sum; FC math stays f32 regardless of x's dtype (bf16-safe).
    w1s = w1_t.astype(jnp.float32) * (1.0 / float(HW))
    w2f = w2_t.astype(jnp.float32)

    bytes_per_elem = C * HW * itemsize
    two_pass = force_two_pass or (4 * bytes_per_elem > vmem_budget)

    if two_pass:
        out3 = _se_two_pass(x3, w1s, w2f,
                            block_target_bytes=block_target_bytes,
                            vmem_limit=vmem_limit)
    else:
        out3 = _se_single_pass(x3, w1s, w2f,
                               num_tensorcores=num_tensorcores,
                               block_target_bytes=block_target_bytes,
                               vmem_budget=vmem_budget,
                               vmem_limit=vmem_limit)
    return out3.reshape(B, C, H, W)


def se_layer_ref(x, w1_t, w2_t):
    pooled = x.astype(jnp.float32).mean(axis=(2, 3))        # (B, C)
    h = jnp.maximum(pooled @ w1_t, 0.0)                     # (B, Cr)
    y = jax.nn.sigmoid(h @ w2_t)                            # (B, C)
    return (x.astype(jnp.float32) * y[:, :, None, None]).astype(x.dtype)


if __name__ == "__main__":
    # Module config (matches SELayer(channel=32, reduction=16)).
    B, C, H, W = 2, 32, 16, 16
    reduction = 16
    Cr = C // reduction

    key = jax.random.PRNGKey(0)
    kx, k1, k2 = jax.random.split(key, 3)

    x = jax.random.normal(kx, (B, C, H, W), dtype=jnp.float32)
    # PyTorch Linear stores (out, in); keep pre-transposed (in, out) for the
    # in-kernel matmuls.  Bias-free, as in the reference module.
    w1 = jax.random.normal(k1, (Cr, C), dtype=jnp.float32) * 0.1   # Linear(C -> C//r)
    w2 = jax.random.normal(k2, (C, Cr), dtype=jnp.float32) * 0.1   # Linear(C//r -> C)
    w1_t = w1.T   # (C, Cr)
    w2_t = w2.T   # (Cr, C)

    ref = se_layer_ref(x, w1_t, w2_t)

    # 1) Single-pass fused path (default dispatch at this shape).
    out = jax.block_until_ready(se_layer(x, w1_t, w2_t))
    assert out.shape == (B, C, H, W)
    assert jnp.allclose(out, ref, atol=1e-5, rtol=1e-5), "single-pass mismatch"

    # 2) Two-pass streaming fallback, forced with small blocks so both the HW
    #    accumulation (pass 1) and the HW-tiled scale (pass 2) are exercised.
    out2 = jax.block_until_ready(
        se_layer(x, w1_t, w2_t, force_two_pass=True, block_target_bytes=16 << 10))
    assert jnp.allclose(out2, ref, atol=1e-5, rtol=1e-5), "two-pass mismatch"

    # 3) bf16 input/output path (pool/FC still accumulate in f32 inside the kernel).
    xb = x.astype(jnp.bfloat16)
    outb = jax.block_until_ready(se_layer(xb, w1_t, w2_t))
    refb = se_layer_ref(xb, w1_t, w2_t).astype(jnp.float32)
    assert outb.dtype == jnp.bfloat16
    assert jnp.allclose(outb.astype(jnp.float32), refb, atol=5e-2, rtol=5e-2), \
        "bf16 path mismatch"

    print("KERNEL_OK")
</pallas_src>

<mosaic_0001>
module attributes {stable_mosaic.version = 11 : i64} {
  func.func @_se_fused_kernel(%arg0: i32, %arg1: memref<2x32x256xf32, #tpu.memory_space<vmem>>, %arg2: memref<32x2xf32, #tpu.memory_space<vmem>>, %arg3: memref<2x32xf32, #tpu.memory_space<vmem>>, %arg4: memref<2x32x256xf32, #tpu.memory_space<vmem>>) attributes {dimension_semantics = [#tpu.dimension_semantics<parallel>], iteration_bounds = array<i64: 1>, scalar_prefetch = 0 : i64, scratch_operands = 0 : i64, tpu.core_type = #tpu.core_type<tc>, window_params = [{transform_indices = @transform_0, window_bounds = array<i64: 2, 32, 256>}, {pipeline_mode = #tpu.pipeline_mode<synchronous>, transform_indices = @transform_1, window_bounds = array<i64: 32, 2>}, {pipeline_mode = #tpu.pipeline_mode<synchronous>, transform_indices = @transform_2, window_bounds = array<i64: 2, 32>}, {transform_indices = @transform_3, window_bounds = array<i64: 2, 32, 256>}]} {
    %c0 = arith.constant 0 : index
    %c0_0 = arith.constant 0 : index
    %c0_1 = arith.constant 0 : index
    %0 = vector.load %arg1[%c0, %c0_0, %c0_1] : memref<2x32x256xf32, #tpu.memory_space<vmem>>, vector<2x32x256xf32>
    %cst = arith.constant dense<0.000000e+00> : vector<2x32xf32>
    %1 = vector.multi_reduction <add>, %0, %cst [2] : vector<2x32x256xf32> to vector<2x32xf32>
    %c0_2 = arith.constant 0 : index
    %c0_3 = arith.constant 0 : index
    %2 = vector.load %arg2[%c0_2, %c0_3] : memref<32x2xf32, #tpu.memory_space<vmem>>, vector<32x2xf32>
    %cst_4 = arith.constant dense<0.000000e+00> : vector<2x2xf32>
    %3 = tpu.matmul %1, %2, %cst_4 {dimension_numbers = #tpu.dot_dimension_numbers<[1], [0], [0], [1], [0, 0, 1, 1], [], []>} : vector<2x32xf32>, vector<32x2xf32>, vector<2x2xf32> -> vector<2x2xf32>
    %cst_5 = arith.constant 0.000000e+00 : f32
    %4 = vector.broadcast %cst_5 : f32 to vector<2x2xf32>
    %5 = arith.maximumf %3, %4 : vector<2x2xf32>
    %c0_6 = arith.constant 0 : index
    %c0_7 = arith.constant 0 : index
    %6 = vector.load %arg3[%c0_6, %c0_7] : memref<2x32xf32, #tpu.memory_space<vmem>>, vector<2x32xf32>
    %cst_8 = arith.constant dense<0.000000e+00> : vector<2x32xf32>
    %7 = tpu.matmul %5, %6, %cst_8 {dimension_numbers = #tpu.dot_dimension_numbers<[1], [0], [0], [1], [0, 0, 1, 1], [], []>} : vector<2x2xf32>, vector<2x32xf32>, vector<2x32xf32> -> vector<2x32xf32>
    %8 = arith.negf %7 : vector<2x32xf32>
    %9 = math.exp %8 : vector<2x32xf32>
    %cst_9 = arith.constant 1.000000e+00 : f32
    %10 = vector.broadcast %cst_9 : f32 to vector<2x32xf32>
    %11 = arith.addf %10, %9 : vector<2x32xf32>
    %12 = arith.divf %10, %11 : vector<2x32xf32>
    %c0_10 = arith.constant 0 : index
    %c0_11 = arith.constant 0 : index
    %c0_12 = arith.constant 0 : index
    %13 = vector.load %arg1[%c0_10, %c0_11, %c0_12] : memref<2x32x256xf32, #tpu.memory_space<vmem>>, vector<2x32x256xf32>
    %14 = vector.shape_cast %12 : vector<2x32xf32> to vector<2x32x1xf32>
    %15 = vector.broadcast %14 : vector<2x32x1xf32> to vector<2x32x256xf32>
    %16 = arith.mulf %13, %15 : vector<2x32x256xf32>
    %c0_13 = arith.constant 0 : index
    %c0_14 = arith.constant 0 : index
    %c0_15 = arith.constant 0 : index
    %17 = vector.load %arg4[%c0_13, %c0_14, %c0_15] : memref<2x32x256xf32, #tpu.memory_space<vmem>>, vector<2x32x256xf32>
    tpu.vector_store %arg4[%c0_13, %c0_14, %c0_15], %16 {strides = array<i32>} : memref<2x32x256xf32, #tpu.memory_space<vmem>>, vector<2x32x256xf32>,
    return
  }
  func.func @transform_0(%arg0: i32) -> (i32, i32, i32) {
    %c0_i32 = arith.constant 0 : i32
    %c0_i32_0 = arith.constant 0 : i32
    %c0_i32_1 = arith.constant 0 : i32
    return %arg0, %c0_i32, %c0_i32_0 : i32, i32, i32
  }
  func.func @transform_1(%arg0: i32) -> (i32, i32) {
    %c0_i32 = arith.constant 0 : i32
    %c0_i32_0 = arith.constant 0 : i32
    %c0_i32_1 = arith.constant 0 : i32
    return %c0_i32, %c0_i32_0 : i32, i32
  }
  func.func @transform_2(%arg0: i32) -> (i32, i32) {
    %c0_i32 = arith.constant 0 : i32
    %c0_i32_0 = arith.constant 0 : i32
    %c0_i32_1 = arith.constant 0 : i32
    return %c0_i32, %c0_i32_0 : i32, i32
  }
  func.func @transform_3(%arg0: i32) -> (i32, i32, i32) {
    %c0_i32 = arith.constant 0 : i32
    %c0_i32_0 = arith.constant 0 : i32
    %c0_i32_1 = arith.constant 0 : i32
    return %arg0, %c0_i32, %c0_i32_0 : i32, i32, i32
  }
}

</mosaic_0001>

<bundles_post_ra>
// kernel: tpu_custom_call.1
= control target key start
LH: loop header
LB: loop body
LE: loop exit
PB: predicated region body
PF: predicated region fallthrough
CT: control target
= control target key end

     0   :  { %8 = vsyncpa [#allocation3], 0  ;;  %s603_s0 = inlined_call_operand.hbm [shape: f32[2,32,256], index: 0, kind: input, shape index: {}]   ;;  %s604_s1 = inlined_call_operand.vmem [shape: f32[32,2], index: 1, kind: input, shape index: {}]   ;;  %s605_s2 = inlined_call_operand.vmem [shape: f32[2,32], index: 2, kind: input, shape index: {}]   ;;  %s606_s3 = inlined_call_operand.hbm [shape: f32[2,32,256], index: 3, kind: output, shape index: {}]  }
   0x1   :  { %9 = vsyncpa [#allocation4], 0  ;;  %s467_s12 = smov [#allocation2]   ;;  %s419_s16 = scalar_lea.hbm %s603_s0, 2048 }
   0x2   :  { %s15_s13 = sshll.u32 %s467_s12, 4  ;;  %p420_p0 = scmp.ne.s32.totalorder %s603_s0, %s419_s16  ;;  %s16_s13 = int_to_ptr.vmem [resolvable:$true] %s15_s13 }
   0x3   :  { %p423_p1 = scmp.lt.u32.totalorder %s419_s16, %s603_s0 }
   0x5   :  { %p425_p2 = pnand %p423_p1, %p420_p0 }
   0x7   :  { %428 = shalt.err (!%p425_p2)
}
   0x8   :  { %s429_s21 = scalar_lea.vmem %s16_s13, 2048  ;;  %p434_p4 = scmp.lt.s32.totalorder %s16_s13, %s16_s13 }
   0x9   :  { %p430_p3 = scmp.ne.s32.totalorder %s16_s13, %s429_s21  ;;  %p435_p5 = scmp.lt.s32.totalorder %s429_s21, %s429_s21 }
   0xb   :  { %p436_p6 = por %p435_p5, %p434_p4 }
   0xd   :  { %p437_p7 = pnand %p436_p6, %p430_p3 }
   0xf   :  { %440 = shalt.err (!%p437_p7)
}
  0x10   :  { %s468_s22 = smov 256   ;;  %s469_s23 = smov 16  }
  0x11   :  { %21 = dma.hbm_to_vmem [thread:$0]  %s603_s0, 2048, %s16_s13, [#allocation3], %s468_s22, %s468_s22, %s469_s23  }
  0x12   :  { %463 = dma.done.wait [#allocation3], 2048  }
  0x13   :  { %464 = vsyncadd [#allocation3], 4294965248  ;;  %v509_v0 = vld [vmem:[#allocation2 + $0x40] sm:$0xff]  ;;  %v511_v1 = vld [vmem:[#allocation2 + $0x48] sm:$0xff]  ;;  %v470_v27 = vmov 0.0|0.0   ;;  %vm471_vm0 = vmmov 0   ;;  %v81_v32 = vlaneseq }
  0x14   :  { %v513_v2 = vld [vmem:[#allocation2] sm:$0xff]  ;;  %v57_v3 = vadd.f32 %v511_v1, %v509_v0  ;;  %v517_v4 = vld [vmem:[#allocation2 + $0x8] sm:$0xff]  ;;  %v519_v5 = vld [vmem:[#allocation2 + $0x50] sm:$0xff]  ;;  %402 = vmatprep.subr.bf16.mxu0 %v470_v27  ;;  %v472_v31 = vmov 0.0   ;;  %vm92_vm1 = vcmask 130112   ;;  %vm99_vm2 = vcmask 195712  }
  0x15   :  { %v521_v6 = vld [vmem:[#allocation2 + $0x58] sm:$0xff]  ;;  %v45_v7 = vadd.f32 %v517_v4, %v513_v2  ;;  %v525_v8 = vld [vmem:[#allocation2 + $0x10] sm:$0xff]  ;;  %v533_v12 = vld [vmem:[#allocation2 + $0x60] sm:$0xff]  ;;  %394 = vmatprep.mubr.msk.f32.mxu0 %vm471_vm0, %v472_v31  ;;  %397 = vmatprep.subr.mxu1 %v472_v31  ;;  %v82_v33 = vand.u32 127, %v81_v32  ;;  %v84_v38 = vshrl.u32 %v81_v32, 7  ;;  %vm106_vm3 = vcmask 261312  }
  0x16   :  { %v527_v9 = vld [vmem:[#allocation2 + $0x18] sm:$0xff]  ;;  %58 = vadd.xlane.f32.xlu1 %v57_v3  ;;  %v60_v10 = vadd.f32 %v521_v6, %v519_v5  ;;  %v535_v13 = vld [vmem:[#allocation2 + $0x68] sm:$0xff]  ;;  %v537_v14 = vld [vmem:[#allocation2 + $0x20] sm:$0xff]  ;;  %399 = vmatprep.mubr.msk.f32.mxu1 %vm471_vm0, %v472_v31  ;;  %vm127_vm4 = vcmask 1041409   ;;  %vm129_vm5 = vcmask 261120   ;;  %vm208_vm6 = vcmask 1041408  }
  0x17   :  { %46 = vadd.xlane.f32.xlu0 %v45_v7  ;;  %v48_v11 = vadd.f32 %v527_v9, %v525_v8  ;;  %v539_v15 = vld [vmem:[#allocation2 + $0x28] sm:$0xff]  ;;  %v63_v16 = vadd.f32 %v535_v13, %v533_v12  ;;  %v545_v18 = vld [vmem:[#allocation2 + $0x70] sm:$0xff]  ;;  %v547_v19 = vld [vmem:[#allocation2 + $0x78] sm:$0xff]  ;;  %v87_v36 = vadd.s32 4294967288, %v82_v33  ;;  %v94_v37 = vadd.s32 4294967280, %v82_v33 }
  0x18   :  { %v51_v17 = vadd.f32 %v539_v15, %v537_v14  ;;  %v549_v20 = vld [vmem:[#allocation2 + $0x30] sm:$0xff]  ;;  %v551_v21 = vld [vmem:[#allocation2 + $0x38] sm:$0xff]  ;;  %v66_v22 = vadd.f32 %v547_v19, %v545_v18  ;;  %v69_v24 = vld [vmem:[%s604_s1] sm:$0xff]  ;;  %v101_v42 = vadd.s32 4294967272, %v82_v33  ;;  %v85_v44 = vsub.s32 %v82_v33, %v84_v38 }
  0x19   :  { %v54_v23 = vadd.f32 %v551_v21, %v549_v20  ;;  %v70_v25 = vld [vmem:[%s604_s1 + $0x8] sm:$0xff]  ;;  %v71_v28 = vld [vmem:[%s604_s1 + $0x10] sm:$0xff]  ;;  %v72_v29 = vld [vmem:[%s604_s1 + $0x18] sm:$0xff]  ;;  %v90_v40 = vsub.s32 %v87_v36, %v84_v38  ;;  %v97_v43 = vsub.s32 %v94_v37, %v84_v38  ;;  %vm204_vm7 = vcmask 15360  }
  0x1a   :  { %61 = vadd.xlane.f32.xlu1 %v60_v10  ;;  %v403_v26 = vpack.c.bf16 %v70_v25, %v69_v24  ;;  %v406_v30 = vpack.c.bf16 %v72_v29, %v71_v28  ;;  %v104_v48 = vsub.s32 %v101_v42, %v84_v38  ;;  %v203_v7 = vld [vmem:[%s605_s2] sm:$0x3]  ;;  %v309_v29 = vsub.s32 1, %v84_v38  ;;  %s473_s2 = smov [#allocation5]  }
  0x1b   :  { %49 = vadd.xlane.f32.xlu0 %v48_v11  ;;  %398 = vmatpush3.msk.msra.mxu1 %vm208_vm6, %v203_v7  ;;  %s363_s7 = sshll.u32 %s473_s2, 4  ;;  %s364_s7 = int_to_ptr.vmem [resolvable:$true] %s363_s7 }
  0x1c   :  { %404 = vmatpush3.bf16.msra.mxu0 %v403_v26  ;;  %v290_v26 = vsub.s32 0, %v84_v38  ;;  %s441_s8 = scalar_lea.vmem %s364_s7, 2048  ;;  %p446_p9 = scmp.lt.s32.totalorder %s364_s7, %s364_s7 }
  0x1d   :  { %405 = vmatprep.subr.bf16.mxu0 %v470_v27  ;;  %p442_p8 = scmp.ne.s32.totalorder %s364_s7, %s441_s8  ;;  %p447_p10 = scmp.lt.s32.totalorder %s441_s8, %s441_s8 }
  0x1e   :  { %64 = vadd.xlane.f32.xlu1 %v63_v16 }
  0x1f   :  { %52 = vadd.xlane.f32.xlu0 %v51_v17  ;;  %p448_p11 = por %p447_p10, %p446_p9 }
  0x20   :  { %407 = vmatpush3.bf16.msra.mxu0 %v406_v30 }
  0x21   :  { %p449_p12 = pnand %p448_p11, %p442_p8 }
  0x22   :  { %67 = vadd.xlane.f32.xlu1 %v66_v22 }
  0x23   :  { %55 = vadd.xlane.f32.xlu0 %v54_v23 }
  0xa3   :  { %v59_v34 = vpop.xlane.xlu1 %58 }
  0xa4   :  { %v47_v35 = vpop.xlane.xlu0 %46  ;;  %v111_v51 = vrot.slane %v59_v34, %v85_v44 }
  0xa5   :  { %v86_v53 = vrot.slane %v47_v35, %v85_v44 }
  0xa7   :  { %v62_v39 = vpop.xlane.xlu1 %61 }
  0xa8   :  { %v50_v41 = vpop.xlane.xlu0 %49  ;;  %v115_v46 = vrot.slane %v62_v39, %v90_v40 }
  0xa9   :  { %v91_v49 = vrot.slane %v50_v41, %v90_v40 }
  0xaa   :  { %v116_v55 = vsel %vm92_vm1, %v115_v46, %v111_v51 }
  0xab   :  { %v65_v45 = vpop.xlane.xlu1 %64  ;;  %v93_v58 = vsel %vm92_vm1, %v91_v49, %v86_v53 }
  0xac   :  { %v53_v47 = vpop.xlane.xlu0 %52  ;;  %v120_v50 = vrot.slane %v65_v45, %v97_v43 }
  0xad   :  { %v98_v52 = vrot.slane %v53_v47, %v97_v43 }
  0xae   :  { %v121_v59 = vsel %vm99_vm2, %v120_v50, %v116_v55 }
  0xaf   :  { %v68_v54 = vpop.xlane.xlu1 %67  ;;  %v100_v61 = vsel %vm99_vm2, %v98_v52, %v93_v58 }
  0xb0   :  { %v125_v56 = vrot.slane %v68_v54, %v104_v48  ;;  %v56_v57 = vpop.xlane.xlu0 %55 }
  0xb1   :  { %v105_v60 = vrot.slane %v56_v57, %v104_v48 }
  0xb2   :  { %v126_v62 = vsel %vm106_vm3, %v125_v56, %v121_v59 }
  0xb3   :  { %v107_v63 = vsel %vm106_vm3, %v105_v60, %v100_v61 }
  0xb4   :  { %v128_v3 = vsel %vm127_vm4, %v126_v62, %v107_v63 }
  0xb5   :  { %395 = vmatmul.mubr.msk.f32.vlgmr.msra.gmra.mrb[0].mxu0 %vm129_vm5, %v128_v3 }
 0x188   :  { %v198_v10 = vpop.f32.mrb[0].mxu0 }
 0x189   :  { %v202_v11 = vmax.f32 %v198_v10, 0.0  ;;  %v396_v16 = vpop.f32.mrb[1].mxu0 }
 0x18b   :  { %400 = vmatmul.mubr.msk.f32.vlgmr.msra.gmra.mrb[0].mxu1 %vm204_vm7, %v202_v11 }
 0x25e   :  { %v278_v17 = vpop.f32.mrb[0].mxu1 }
 0x25f   :  { %v378_v22 = vmul.f32 -1.442695, %v278_v17  ;;  %v401_v23 = vpop.f32.mrb[1].mxu1 }
 0x261   :  { %415 = vpow2.f32 %v378_v22 }
 0x26b   :  { %v416_v24 = vpop.eup %415 }
 0x26c   :  { %v285_v25 = vadd.f32 1.0, %v416_v24 }
 0x26e   :  { %417 = vrcp.f32 %v285_v25 }
 0x278   :  { %v418_v27 = vpop.eup %417 }
 0x279   :  { %v291_v28 = vrot.slane %v418_v27, %v290_v26  ;;  %v310_v30 = vrot.slane %v418_v27, %v309_v29 }
 0x27b   :  { %297 = vbcast.lane.b32.xlu1 %v291_v28, 264  ;;  %293 = vbcast.lane.b32.xlu0 %v291_v28, 256 }
 0x27f   :  { %301 = vbcast.lane.b32.xlu1 %v291_v28, 272  ;;  %312 = vbcast.lane.b32.xlu0 %v310_v30, 256 }
 0x283   :  { %305 = vbcast.lane.b32.xlu1 %v291_v28, 280  ;;  %320 = vbcast.lane.b32.xlu0 %v310_v30, 272 }
 0x287   :  { %316 = vbcast.lane.b32.xlu1 %v310_v30, 264 }
 0x28b   :  { %324 = vbcast.lane.b32.xlu1 %v310_v30, 280 }
 0x2ed   :  { %v298_v31 = vpop.permute.xlu1 %297  ;;  %v294_v32 = vpop.permute.xlu0 %293 }
 0x2ee   :  { %v328_v33 = vmul.f32 %v298_v31, %v525_v8  ;;  %v329_v34 = vmul.f32 %v298_v31, %v527_v9  ;;  %v326_v35 = vmul.f32 %v294_v32, %v513_v2  ;;  %v327_v36 = vmul.f32 %v294_v32, %v517_v4 }
 0x2f0   :  { %344 = vst [vmem:[#allocation5 + $0x10] sm:$0xff] %v328_v33  ;;  %345 = vst [vmem:[#allocation5 + $0x18] sm:$0xff] %v329_v34 }
 0x2f1   :  { %342 = vst [vmem:[#allocation5] sm:$0xff] %v326_v35  ;;  %343 = vst [vmem:[#allocation5 + $0x8] sm:$0xff] %v327_v36  ;;  %v302_v37 = vpop.permute.xlu1 %301  ;;  %v313_v38 = vpop.permute.xlu0 %312 }
 0x2f2   :  { %v330_v39 = vmul.f32 %v302_v37, %v537_v14  ;;  %v331_v40 = vmul.f32 %v302_v37, %v539_v15  ;;  %v334_v41 = vmul.f32 %v313_v38, %v509_v0  ;;  %v335_v8 = vmul.f32 %v313_v38, %v511_v1 }
 0x2f4   :  { %346 = vst [vmem:[#allocation5 + $0x20] sm:$0xff] %v330_v39  ;;  %347 = vst [vmem:[#allocation5 + $0x28] sm:$0xff] %v331_v40 }
 0x2f5   :  { %350 = vst [vmem:[#allocation5 + $0x40] sm:$0xff] %v334_v41  ;;  %351 = vst [vmem:[#allocation5 + $0x48] sm:$0xff] %v335_v8  ;;  %v306_v2 = vpop.permute.xlu1 %305  ;;  %v321_v4 = vpop.permute.xlu0 %320 }
 0x2f6   :  { %v332_v9 = vmul.f32 %v306_v2, %v549_v20  ;;  %v333_v42 = vmul.f32 %v306_v2, %v551_v21  ;;  %v338_v43 = vmul.f32 %v321_v4, %v533_v12  ;;  %v339_v14 = vmul.f32 %v321_v4, %v535_v13 }
 0x2f8   :  { %348 = vst [vmem:[#allocation5 + $0x30] sm:$0xff] %v332_v9  ;;  %349 = vst [vmem:[#allocation5 + $0x38] sm:$0xff] %v333_v42 }
 0x2f9   :  { %354 = vst [vmem:[#allocation5 + $0x60] sm:$0xff] %v338_v43  ;;  %355 = vst [vmem:[#allocation5 + $0x68] sm:$0xff] %v339_v14  ;;  %v317_v0 = vpop.permute.xlu1 %316 }
 0x2fa   :  { %v336_v1 = vmul.f32 %v317_v0, %v519_v5  ;;  %v337_v15 = vmul.f32 %v317_v0, %v521_v6 }
 0x2fc   :  { %352 = vst [vmem:[#allocation5 + $0x50] sm:$0xff] %v336_v1  ;;  %353 = vst [vmem:[#allocation5 + $0x58] sm:$0xff] %v337_v15 }
 0x2fd   :  { %v325_v20 = vpop.permute.xlu1 %324 }
 0x2fe   :  { %v340_v21 = vmul.f32 %v325_v20, %v545_v18  ;;  %v341_v12 = vmul.f32 %v325_v20, %v547_v19 }
 0x300   :  { %356 = vst [vmem:[#allocation5 + $0x70] sm:$0xff] %v340_v21  ;;  %357 = vst [vmem:[#allocation5 + $0x78] sm:$0xff] %v341_v12 }
 0x301   :  { %452 = shalt.err (!%p449_p12)
}
 0x302   :  { %s453_s11 = scalar_lea.hbm %s606_s3, 2048 }
 0x303   :  { %p454_p13 = scmp.ne.s32.totalorder %s606_s3, %s453_s11  ;;  %p457_p0 = scmp.lt.u32.totalorder %s453_s11, %s606_s3 }
 0x305   :  { %p459_p1 = pnand %p457_p0, %p454_p13 }
 0x307   :  { %462 = shalt.err (!%p459_p1)
}
 0x308   :  { %369 = dma.vmem_to_hbm [thread:$0]  %s364_s7, 2048, %s606_s3, [#allocation4], %s468_s22, %s468_s22, %s469_s23  }
 0x309   :  { %465 = dma.done.wait [#allocation4], 2048  }
 0x30a   :  { %466 = vsyncadd [#allocation4], 4294965248 }
 0x30b   :  { %373 = vsyncpa [#allocation3], 1 }
 0x30c   :  { %374 = vsyncpa [#allocation4], 1 }

</bundles_post_ra>
